<compile_context>
chip_gen: v7x
topology: tpu7x:2x2x1
jax: 0.10.0
libtpu: 0.0.40
codegen_flags: <defaults>
</compile_context>

<pallas_src>
import functools

import jax
import jax.numpy as jnp
from jax.experimental import pallas as pl
from jax.experimental.pallas import tpu as pltpu


def _round_up(x, m):
    return ((x + m - 1) // m) * m


def critic_head_kernel(h_ref, w1_ref, w2_ref, out_ref, acc_ref):
    # h_ref:   (B_pad, H_pad)   bf16  resident last-token hidden states
    # w1_ref:  (tk, 512)        bf16  streamed tile of this split's W1 columns
    # w2_ref:  (512, 512)       bf16  this split's W2 rows (fetched once)
    # out_ref: (1, B_pad, 512)  f32   layer-2 partial pre-activation
    # acc_ref: (B_pad, 512)     f32   VMEM scratch: layer-1 accumulator
    k = pl.program_id(1)
    tk = w1_ref.shape[0]

    @pl.when(k == 0)
    def _init():
        acc_ref[...] = jnp.zeros_like(acc_ref)

    # Layer-1 partial product for this tk slab: bf16 MXU operands, f32 acc.
    h_blk = h_ref[:, pl.ds(pl.multiple_of(k * tk, 128), tk)]
    acc_ref[...] += jnp.dot(h_blk, w1_ref[...],
                            preferred_element_type=jnp.float32)

    @pl.when(k == pl.num_programs(1) - 1)
    def _finalize():
        # ReLU in f32 on the accumulator (v5e VPU has no bf16); only the MXU
        # operand is cast back to bf16 for the native matmul path.
        x1 = jnp.maximum(acc_ref[...], 0.0).astype(jnp.bfloat16)      # (B, 512)
        out_ref[0] = jnp.dot(x1, w2_ref[...],
                             preferred_element_type=jnp.float32)       # (B, 512)


@functools.partial(jax.jit, static_argnames=("block_k",))
def critic_values(hidden_states, w1_t, w2_t, w3, *, block_k=2048):
    """hidden_states: (B, S, H) last-layer hidden states of the base model.
    w1_t: (H, 1024) bf16, w2_t: (1024, 512) bf16, w3: (512,) or (1, 512) bf16.
    Returns values of shape (B,), matching `.squeeze(-1)` in the module."""
    B, S, H = hidden_states.shape
    assert w1_t.shape == (H, 1024) and w2_t.shape == (1024, 512)

    # Last-token select + cast; h goes to the MXU in bf16 (halves its DMA,
    # removes any in-kernel cast).  Downstream math accumulates in f32.
    # TODO(synk): fuse the last-token gather into the pallas_call with a
    # manual DMA (memory_space=pl.ANY) when S*H becomes large enough to matter.
    h_last = hidden_states[:, -1, :].astype(jnp.bfloat16)

    # Pad batch to a full sublane tile and H to a multiple of the reduction
    # tile tk (zero rows/cols are harmless through the bias-free matmuls).
    B_pad = _round_up(B, 8)
    H_pad = _round_up(H, 128)
    if H_pad <= block_k:
        tk = H_pad
    else:
        tk = max(128, (block_k // 128) * 128)
        H_pad = _round_up(H_pad, tk)
    grid_k = H_pad // tk

    h_pad = jnp.zeros((B_pad, H_pad), jnp.bfloat16).at[:B, :H].set(h_last)
    w1_p = w1_t if H_pad == H else (
        jnp.zeros((H_pad, 1024), w1_t.dtype).at[:H].set(w1_t))

    # W1 is the dominant HBM stream: triple-buffer it when the inner axis is
    # long enough for extra DMA lookahead to matter.  h / W2 have constant
    # index_maps, so their tiles are fetched once and never re-DMAed.
    w1_spec_kwargs = {}
    if grid_k >= 3:
        w1_spec_kwargs["pipeline_mode"] = pl.Buffered(3)

    flops = 2 * B_pad * (H_pad * 1024 + 1024 * 512)
    bytes_accessed = ((H_pad * 1024 + 1024 * 512) * 2      # bf16 weights
                      + B_pad * H_pad * 2                   # bf16 hidden
                      + 2 * B_pad * 512 * 4)                # f32 partials

    partials = pl.pallas_call(
        critic_head_kernel,
        out_shape=jax.ShapeDtypeStruct((2, B_pad, 512), jnp.float32),
        grid_spec=pltpu.PrefetchScalarGridSpec(
            num_scalar_prefetch=0,
            grid=(2, grid_k),                  # (layer-1 column split, H stream)
            in_specs=[
                pl.BlockSpec((B_pad, H_pad), lambda c, k: (0, 0)),   # h resident
                pl.BlockSpec((tk, 512), lambda c, k: (k, c),         # W1 tile
                             **w1_spec_kwargs),
                pl.BlockSpec((512, 512), lambda c, k: (c, 0)),       # W2 half
            ],
            out_specs=pl.BlockSpec((1, B_pad, 512), lambda c, k: (c, 0, 0)),
            scratch_shapes=[pltpu.VMEM((B_pad, 512), jnp.float32)],
        ),
        compiler_params=pltpu.CompilerParams(
            # Leading axis: independent column halves -> both TensorCores on
            # v7x; trailing axis: the H reduction (accumulator), sequential.
            dimension_semantics=("parallel", "arbitrary"),
            vmem_limit_bytes=32 * 1024 * 1024,   # fits v7x's scoped default
        ),
        cost_estimate=pl.CostEstimate(
            flops=flops, transcendentals=0, bytes_accessed=bytes_accessed),
    )(h_pad, w1_p, w2_t)

    # Tiny fused XLA epilogue: combine the two 512-wide halves, second ReLU,
    # then the N=1 Linear(512, 1) as a VPU multiply + lane reduction.
    x2 = jnp.maximum(partials[0] + partials[1], 0.0)                  # (B_pad, 512)
    values = jnp.sum(x2 * w3.reshape(1, -1).astype(jnp.float32), axis=-1)
    return values[:B]


def critic_values_ref(hidden_states, w1_t, w2_t, w3):
    h = hidden_states[:, -1, :].astype(jnp.bfloat16)
    x = jnp.maximum(jnp.dot(h, w1_t, preferred_element_type=jnp.float32), 0.0)
    x = jnp.maximum(jnp.dot(x.astype(jnp.bfloat16), w2_t,
                            preferred_element_type=jnp.float32), 0.0)
    return jnp.sum(x * w3.reshape(1, -1).astype(jnp.float32), axis=-1)


if __name__ == "__main__":
    # Small, module-consistent shapes: batch=2, seq=8, hidden (n_embd)=256.
    # block_k=128 so the H-streaming ("arbitrary") axis takes 2 accumulation
    # steps and exercises the init/accumulate/finalize path.
    B, S, H = 2, 8, 256
    key = jax.random.PRNGKey(0)
    k_hs, k1, k2, k3 = jax.random.split(key, 4)

    # TODO(synk): the base transformer (`rwtranrsformer`) is an external
    # module passed into __init__; stand in for its last-layer hidden states
    # with a deterministic random tensor of shape (B, S, H).
    hidden_states = jax.random.normal(k_hs, (B, S, H), jnp.float32)

    # Value-head weights (nn.Linear(..., bias=False)), stored in bf16 and
    # pre-transposed to (in_features, out_features); W3 as a 512-long row.
    w1_t = (jax.random.normal(k1, (H, 1024), jnp.float32) * 0.02).astype(jnp.bfloat16)
    w2_t = (jax.random.normal(k2, (1024, 512), jnp.float32) * 0.02).astype(jnp.bfloat16)
    w3 = (jax.random.normal(k3, (512,), jnp.float32) * 0.02).astype(jnp.bfloat16)

    values = jax.block_until_ready(
        critic_values(hidden_states, w1_t, w2_t, w3, block_k=128))
    ref = jax.block_until_ready(critic_values_ref(hidden_states, w1_t, w2_t, w3))

    assert values.shape == (B,), values.shape
    assert jnp.allclose(values, ref, atol=2e-3, rtol=2e-2), (values, ref)
    print("KERNEL_OK")
</pallas_src>

<mosaic_0001>
module attributes {stable_mosaic.version = 11 : i64} {
  func.func @critic_head_kernel(%arg0: i32, %arg1: i32, %arg2: memref<8x256xbf16, #tpu.memory_space<vmem>>, %arg3: memref<128x512xbf16, #tpu.memory_space<vmem>>, %arg4: memref<512x512xbf16, #tpu.memory_space<vmem>>, %arg5: memref<1x8x512xf32, #tpu.memory_space<vmem>>, %arg6: memref<8x512xf32, #tpu.memory_space<vmem>>) attributes {dimension_semantics = [#tpu.dimension_semantics<parallel>, #tpu.dimension_semantics<arbitrary>], iteration_bounds = array<i64: 2, 2>, scalar_prefetch = 0 : i64, scratch_operands = 1 : i64, tpu.core_type = #tpu.core_type<tc>, window_params = [{pipeline_mode = #tpu.pipeline_mode<synchronous>, transform_indices = @transform_0, window_bounds = array<i64: 8, 256>}, {transform_indices = @transform_1, window_bounds = array<i64: 128, 512>}, {transform_indices = @transform_2, window_bounds = array<i64: 512, 512>}, {transform_indices = @transform_3, window_bounds = array<i64: 1, 8, 512>}]} {
    %c0_i32 = arith.constant 0 : i32
    %0 = arith.cmpi eq, %arg1, %c0_i32 : i32
    %1 = arith.extui %0 : i1 to i32
    %c0_i32_0 = arith.constant 0 : i32
    %2 = arith.cmpi ne, %1, %c0_i32_0 : i32
    scf.if %2 {
      %cst_8 = arith.constant 0.000000e+00 : f32
      %15 = vector.broadcast %cst_8 : f32 to vector<8x512xf32>
      %c0_9 = arith.constant 0 : index
      %c0_10 = arith.constant 0 : index
      %16 = vector.load %arg6[%c0_9, %c0_10] : memref<8x512xf32, #tpu.memory_space<vmem>>, vector<8x512xf32>
      tpu.vector_store %arg6[%c0_9, %c0_10], %15 {strides = array<i32>} : memref<8x512xf32, #tpu.memory_space<vmem>>, vector<8x512xf32>,
    } else {
    }
    %c128_i32 = arith.constant 128 : i32
    %3 = arith.muli %arg1, %c128_i32 : i32
    %4 = tpu.assume_multiple %3, 128 : i32
    %c0 = arith.constant 0 : index
    %5 = arith.index_cast %4 : i32 to index
    %6 = vector.load %arg2[%c0, %5] : memref<8x256xbf16, #tpu.memory_space<vmem>>, vector<8x128xbf16>
    %c0_1 = arith.constant 0 : index
    %c0_2 = arith.constant 0 : index
    %7 = vector.load %arg6[%c0_1, %c0_2] : memref<8x512xf32, #tpu.memory_space<vmem>>, vector<8x512xf32>
    %c0_3 = arith.constant 0 : index
    %c0_4 = arith.constant 0 : index
    %8 = vector.load %arg3[%c0_3, %c0_4] : memref<128x512xbf16, #tpu.memory_space<vmem>>, vector<128x512xbf16>
    %cst = arith.constant dense<0.000000e+00> : vector<8x512xf32>
    %9 = tpu.matmul %6, %8, %cst {dimension_numbers = #tpu.dot_dimension_numbers<[1], [0], [0], [1], [0, 0, 1, 1], [], []>} : vector<8x128xbf16>, vector<128x512xbf16>, vector<8x512xf32> -> vector<8x512xf32>
    %10 = arith.addf %7, %9 : vector<8x512xf32>
    %c0_5 = arith.constant 0 : index
    %c0_6 = arith.constant 0 : index
    %11 = vector.load %arg6[%c0_5, %c0_6] : memref<8x512xf32, #tpu.memory_space<vmem>>, vector<8x512xf32>
    tpu.vector_store %arg6[%c0_5, %c0_6], %10 {strides = array<i32>} : memref<8x512xf32, #tpu.memory_space<vmem>>, vector<8x512xf32>,
    %c1_i32 = arith.constant 1 : i32
    %12 = arith.cmpi eq, %arg1, %c1_i32 : i32
    %13 = arith.extui %12 : i1 to i32
    %c0_i32_7 = arith.constant 0 : i32
    %14 = arith.cmpi ne, %13, %c0_i32_7 : i32
    scf.if %14 {
      %c0_8 = arith.constant 0 : index
      %c0_9 = arith.constant 0 : index
      %15 = vector.load %arg6[%c0_8, %c0_9] : memref<8x512xf32, #tpu.memory_space<vmem>>, vector<8x512xf32>
      %cst_10 = arith.constant 0.000000e+00 : f32
      %16 = vector.broadcast %cst_10 : f32 to vector<8x512xf32>
      %17 = arith.maximumf %15, %16 : vector<8x512xf32>
      %18 = arith.truncf %17 : vector<8x512xf32> to vector<8x512xbf16>
      %c0_11 = arith.constant 0 : index
      %c0_12 = arith.constant 0 : index
      %19 = vector.load %arg4[%c0_11, %c0_12] : memref<512x512xbf16, #tpu.memory_space<vmem>>, vector<512x512xbf16>
      %cst_13 = arith.constant dense<0.000000e+00> : vector<8x512xf32>
      %20 = tpu.matmul %18, %19, %cst_13 {dimension_numbers = #tpu.dot_dimension_numbers<[1], [0], [0], [1], [0, 0, 1, 1], [], []>} : vector<8x512xbf16>, vector<512x512xbf16>, vector<8x512xf32> -> vector<8x512xf32>
      %c0_14 = arith.constant 0 : index
      %c0_15 = arith.constant 0 : index
      %c0_16 = arith.constant 0 : index
      %21 = vector.load %arg5[%c0_14, %c0_15, %c0_16] : memref<1x8x512xf32, #tpu.memory_space<vmem>>, vector<1x8x512xf32>
      %22 = vector.shape_cast %21 : vector<1x8x512xf32> to vector<8x512xf32>
      %23 = vector.shape_cast %20 : vector<8x512xf32> to vector<1x8x512xf32>
      tpu.vector_store %arg5[%c0_14, %c0_15, %c0_16], %23 {strides = array<i32>} : memref<1x8x512xf32, #tpu.memory_space<vmem>>, vector<1x8x512xf32>,
    } else {
    }
    return
  }
  func.func @transform_0(%arg0: i32, %arg1: i32) -> (i32, i32) {
    %c0_i32 = arith.constant 0 : i32
    %c0_i32_0 = arith.constant 0 : i32
    %c0_i32_1 = arith.constant 0 : i32
    return %c0_i32, %c0_i32_0 : i32, i32
  }
  func.func @transform_1(%arg0: i32, %arg1: i32) -> (i32, i32) {
    %c0_i32 = arith.constant 0 : i32
    return %arg1, %arg0 : i32, i32
  }
  func.func @transform_2(%arg0: i32, %arg1: i32) -> (i32, i32) {
    %c0_i32 = arith.constant 0 : i32
    %c0_i32_0 = arith.constant 0 : i32
    return %arg0, %c0_i32 : i32, i32
  }
  func.func @transform_3(%arg0: i32, %arg1: i32) -> (i32, i32, i32) {
    %c0_i32 = arith.constant 0 : i32
    %c0_i32_0 = arith.constant 0 : i32
    %c0_i32_1 = arith.constant 0 : i32
    return %arg0, %c0_i32, %c0_i32_0 : i32, i32, i32
  }
}

</mosaic_0001>

<bundles_post_ra>
// kernel: critic_values.1
= control target key start
LH: loop header
LB: loop body
LE: loop exit
PB: predicated region body
PF: predicated region fallthrough
CT: control target
= control target key end

     0   :  { %s2771_s0 = inlined_call_operand.vmem [shape: bf16[8,256], index: 0, kind: input, shape index: {}]   ;;  %s2772_s1 = inlined_call_operand.hbm [shape: bf16[256,1024], index: 1, kind: input, shape index: {}]   ;;  %s2773_s2 = inlined_call_operand.hbm [shape: bf16[1024,512], index: 2, kind: input, shape index: {}]   ;;  %s2774_s3 = inlined_call_operand.vmem [shape: f32[2,8,512], index: 3, kind: output, shape index: {}]  }
   0x1   :  { %2781 = sst [smem:[#allocation11_spill]] %s2771_s0 }
   0x2   :  { %8 = vsyncpa [#allocation4], 0 }
   0x3   :  { %10 = vsyncpa [#allocation4 + $0x1], 0 }
   0x4   :  { %11 = vsyncpa [#allocation6], 0 }
   0x5   :  { %13 = vsyncpa [#allocation6 + $0x1], 0  ;;  %s2335_s12 = smov 0   ;;  %s2337_s13 = smov 0  }
   0x6   :  { %s2339_s14 = smov 0   ;;  %s2341_s15 = smov 0  }
   0x7   :  { %s2343_s16 = smov 0   ;;  %s2345_s17 = smov 0  }
   0x8   :  { %s2347_s18 = smov 0   ;;  %s2349_s19 = smov 0  }
   0x9   :  { %s2351_s20 = smov 0   ;;  %s2353_s21 = smov 0  }
   0xa   :  { %s2355_s22 = smov 0  }
   0xb LB: > { %s28_s23 = sadd.s32 1, %s2298_s20  ;;  %s31_s24 = sadd.s32 1, %s2302_s21  ;;  %s2306_s22 = sphi %s2355_s22, %s19_s22   ;;  %s2302_s21 = sphi %s2353_s21, %s2807_s21   ;;  %s2298_s20 = sphi %s2351_s20, %s2806_s20   ;;  %s2294_s19 = sphi %s2349_s19, %s2805_s19   ;;  %s2290_s18 = sphi %s2347_s18, %s2804_s18   ;;  %s2286_s17 = sphi %s2345_s17, %s2803_s17   ;;  %s2282_s16 = sphi %s2343_s16, %s2802_s16   ;;  %s2278_s15 = sphi %s2341_s15, %s2801_s15   ;;  %s2274_s14 = sphi %s2339_s14, %s2800_s14   ;;  %s2270_s13 = sphi %s2337_s13, %s2799_s13   ;;  %s2266_s12 = sphi %s2335_s12, %s2798_s12  }
   0xc   : > { %p29_p0 = scmp.ge.s32.totalorder %s28_s23, 2  ;;  %s61_s25 = sadd.s32 1, %s2286_s17 }
   0xd   : > { %p68_p1 = scmp.ne.s32.totalorder %s2286_s17, %s2282_s16  ;;  %p2778_p2 = scmp.eq.s32.totalorder %s2306_s22, 0 }
   0xe   : > { %s2809_s23 = smov (%p29_p0, %s28_s23), 0  ;;  %s2811_s24 = smov (!%p29_p0, %s31_s24), %s2302_s21 }
   0xf   : > { %2782 = sst [smem:[#allocation9_spill]] %s2809_s23  ;;  %s56_s26 = ssub.s32 %s2298_s20, %s2809_s23 }
  0x10   : > { %p2403_p3 = por %p2778_p2, %p68_p1  ;;  %p33_p4 = scmp.ge.s32.totalorder %s2811_s24, 2 }
  0x11   : > { %p2777_p6 = scmp.lt.s32.totalorder %s2306_s22, 4  ;;  %s153_s28 = sand.u32 1, %s2286_s17  }
  0x12   : > { %s2813_s24 = smov (%p33_p4, %s2811_s24), 0  ;;  %s1617_s29 = sshll.u32 %s2302_s21, 2 }
  0x13   : > { %2784 = sst [smem:[#allocation10_spill]] %s2813_s24  ;;  %s2416_s30 = ssub.s32 %s2302_s21, %s2813_s24 }
  0x14   : > { %s58_s4 = sor.u32 %s2416_s30, %s56_s26  ;;  %p85_p7 = scmp.eq.s32.totalorder %s2416_s30, 0 }
  0x15   : > { %p59_p8 = scmp.eq.s32.totalorder %s58_s4, 0  ;;  %s1615_s5 = sshll.u32 %s153_s28, 8 }
  0x16   : > { %s1795_s6 = sshll.u32 %s2298_s20, 7  ;;  %s157_s9 = scalar_lea.vmem [#allocation3], %s1615_s5 }
  0x17   : > { %s2422_s7 = scalar_select %p59_p8, %s2286_s17, %s61_s25  }
  0x18   : > { %s164_s8 = sadd.s32 %s1795_s6, %s1617_s29  ;;  %s167_s10 = sshll.u32 %s157_s9, 4  ;;  %s2424_s10 = int_to_ptr.vmem [resolvable:$true] %s167_s10 }
  0x19   : > { %s1619_s11 = sshll.u32 %s164_s8, 6  ;;  %p2435_p9 = pnand %p2777_p6, %p2403_p3 }
  0x1a   : > { %s2429_s24 = scalar_lea.hbm %s2772_s1, %s1619_s11  ;;  %s2439_s26 = scalar_lea.sflag [#allocation4], %s153_s28 }
  0x1b   : > { %s2152_s29 = scalar_lea.hbm %s2429_s24, 4096  ;;  %p2154_p11 = pneg %p2435_p9 }
  0x1c   : > { %p2153_p10 = scmp.ne.s32.totalorder %s2429_s24, %s2152_s29  ;;  %s2157_s27 = scalar_lea.hbm %s2772_s1, 16384 }
  0x1d   : > { %p2158_p0 = scmp.lt.u32.totalorder %s2429_s24, %s2772_s1  ;;  %p2159_p1 = scmp.lt.u32.totalorder %s2157_s27, %s2152_s29 }
  0x1e   : > { %p2155_p12 = pnand %p2154_p11, %p2153_p10  ;;  %p2161_p4 = scmp.lt.u32.totalorder %s2152_s29, %s2429_s24 }
  0x1f   : > { %p2160_p3 = por %p2159_p1, %p2158_p0 }
  0x20   : > { %p2156_p13 = pneg %p2155_p12 }
  0x21   : > { %p2162_p8 = por %p2161_p4, %p2160_p3 }
  0x23   : > { %p2163_p6 = pnand %p2162_p8, %p2156_p13 }
  0x25   : > { %2166 = shalt.err (!%p2163_p6)
}
  0x26   : > { %s2167_s28 = scalar_lea.vmem %s2424_s10, 4096  ;;  %s2308_s6 = smov [#allocation3]  }
  0x27   : > { %p2168_p10 = scmp.ne.s32.totalorder %s2424_s10, %s2167_s28  ;;  %s2172_s8 = sshll.u32 %s2308_s6, 4  ;;  %s2173_s8 = int_to_ptr.vmem [resolvable:$false] %s2172_s8 }
  0x28   : > { %s2174_s9 = scalar_lea.vmem %s2173_s8, 8192  ;;  %p2175_p5 = scmp.lt.s32.totalorder %s2424_s10, %s2173_s8 }
  0x29   : > { %p2170_p12 = pnand %p2168_p10, %p2154_p11  ;;  %p2176_p0 = scmp.lt.s32.totalorder %s2174_s9, %s2167_s28 }
  0x2b   : > { %p2171_p2 = pneg %p2170_p12  ;;  %p2177_p1 = por %p2176_p0, %p2175_p5 }
  0x2d   : > { %p2178_p3 = pnand %p2177_p1, %p2171_p2 }
  0x2f   : > { %2181 = shalt.err (!%p2178_p3)
}
  0x30   : > { %s2309_s11 = smov 512   ;;  %s2310_s29 = smov 256  }
  0x31   : > { %s2311_s0 = smov 16   ;;  %p1624_p2 = scmp.ge.s32.totalorder %s2306_s22, 1 }
  0x32   : > { %1814 = dma.hbm_to_vmem [thread:$0]  (!%p2435_p9), %s2429_s24, 4096, %s2424_s10, %s2439_s26, %s2309_s11, %s2310_s29, %s2311_s0  }
  0x33   : > { %p197_p5 = scmp.lt.s32.totalorder %s2306_s22, 5  ;;  %s1611_s27 = sadd.s32 4294967295, %s2306_s22  }
  0x34   : > { %p75_p11 = scmp.eq.s32.totalorder %s1611_s27, 0  ;;  %s87_s4 = sadd.s32 1, %s2274_s14 }
  0x35   : > { %p2471_p6 = pnand %p1624_p2, %p197_p5  ;;  %p2787_p13 = scmp.ne.s32.totalorder %s2282_s16, %s2278_s15 }
  0x36   : > { %s2480_s5 = scalar_select %p85_p7, %s2274_s14, %s87_s4  }
  0x37   : > { %p2485_p4 = por %p75_p11, %p2787_p13  ;;  %p94_p8 = scmp.ne.s32.totalorder %s2274_s14, %s2270_s13 }
  0x38   : > { %p100_p9 = scmp.ne.s32.totalorder %s2270_s13, %s2266_s12  ;;  %s177_s24 = sand.u32 1, %s2274_s14  }
  0x39   : > { %s2788_s25 = scalar_select %p2485_p4, 1, 0 }
  0x3a   : > { %p2789_p10 = scmp.eq.s32.totalorder %s2306_s22, 0  ;;  %p2496_p0 = por %p100_p9, %p75_p11 }
  0x3b   : > { %s1620_s26 = sshll.u32 %s177_s24, 10  ;;  %s1797_s28 = sshll.u32 %s2302_s21, 14 }
  0x3c   : > { %p96_p12 = por %p94_p8, %p2789_p10  ;;  %s2504_s8 = scalar_lea.hbm %s2773_s2, %s1797_s28 }
  0x3d   : > { %s2790_s10 = scalar_select %p2496_p0, 1, 0 }
  0x3e   : > { %s181_s15 = scalar_lea.vmem [#allocation5], %s1620_s26  ;;  %p2791_p7 = scmp.lt.s32.totalorder %s2306_s22, 4 }
  0x3f   : > { %s189_s12 = sshll.u32 %s181_s15, 4  ;;  %s2514_s11 = scalar_lea.sflag [#allocation6], %s177_s24  ;;  %s2506_s12 = int_to_ptr.vmem [resolvable:$true] %s189_s12 }
  0x40   : > { %p2510_p1 = pnand %p2791_p7, %p96_p12  ;;  %s2182_s27 = scalar_lea.hbm %s2504_s8, 16384 }
  0x41   : > { %p2183_p3 = scmp.ne.s32.totalorder %s2504_s8, %s2182_s27  ;;  %s2187_s28 = scalar_lea.hbm %s2773_s2, 32768 }
  0x42   : > { %p2184_p2 = pneg %p2510_p1  ;;  %p2188_p13 = scmp.lt.u32.totalorder %s2504_s8, %s2773_s2 }
  0x43   : > { %p2189_p8 = scmp.lt.u32.totalorder %s2187_s28, %s2182_s27  ;;  %p2191_p10 = scmp.lt.u32.totalorder %s2182_s27, %s2504_s8 }
  0x44   : > { %p2185_p5 = pnand %p2184_p2, %p2183_p3 }
  0x45   : > { %p2190_p9 = por %p2189_p8, %p2188_p13 }
  0x46   : > { %p2186_p11 = pneg %p2185_p5 }
  0x47   : > { %p2192_p12 = por %p2191_p10, %p2190_p9 }
  0x49   : > { %p2193_p7 = pnand %p2192_p12, %p2186_p11 }
  0x4b   : > { %2196 = shalt.err (!%p2193_p7)
}
  0x4c   : > { %s2197_s24 = scalar_lea.vmem %s2506_s12, 16384  ;;  %s2312_s15 = smov [#allocation5]  }
  0x4d   : > { %p2198_p3 = scmp.ne.s32.totalorder %s2506_s12, %s2197_s24  ;;  %s2202_s4 = sshll.u32 %s2312_s15, 4  ;;  %s2203_s4 = int_to_ptr.vmem [resolvable:$false] %s2202_s4 }
  0x4e   : > { %s2204_s26 = scalar_lea.vmem %s2203_s4, 32768  ;;  %p2205_p4 = scmp.lt.s32.totalorder %s2506_s12, %s2203_s4 }
  0x4f   : > { %p2200_p5 = pnand %p2198_p3, %p2184_p2  ;;  %p2206_p13 = scmp.lt.s32.totalorder %s2204_s26, %s2197_s24 }
  0x51   : > { %p2201_p0 = pneg %p2200_p5  ;;  %p2207_p8 = por %p2206_p13, %p2205_p4 }
  0x53   : > { %p2208_p9 = pnand %p2207_p8, %p2201_p0 }
  0x55   : > { %2211 = shalt.err (!%p2208_p9)
}
  0x56   : > { %1817 = dma.hbm_to_vmem [thread:$0]  (!%p2510_p1), %s2504_s8, 16384, %s2506_s12, %s2514_s11, %s2310_s29, %s2310_s29, %s2311_s0  }
  0x57   : > { %201 = sbr.rel (%p2471_p6) target bundleno = 653 (0x28d), region = 32  ;;  %s203_s27 = sand.u32 (!%p2471_p6), 1, %s2282_s16  }
  0x58   : > { %s1625_s28 = sshll.u32 (!%p2471_p6), %s203_s27, 8  ;;  %s204_s6 = scalar_lea.sflag (!%p2471_p6), [#allocation4], %s203_s27 }
  0x59   : > { %s2548_s30 = scalar_lea.vmem (!%p2471_p6), [#allocation3], %s1625_s28  ;;  %p2793_p4 = scmp.ne.s32.totalorder (!%p2471_p6), %s2788_s25, 0 }
  0x5e   : > { %2257 = dma.done.wait (%p2793_p4), %s204_s6, 4096  }
  0x5f   : > { %2259 = vsyncadd (%p2793_p4), %s204_s6, 4294963200  ;;  %s212_s9 = sand.u32 1, %s2270_s13   ;;  %p2794_p6 = scmp.ne.s32.totalorder %s2790_s10, 0 }
  0x60   : > { %s1626_s24 = sshll.u32 %s212_s9, 10  ;;  %s213_s29 = scalar_lea.sflag [#allocation6], %s212_s9 }
  0x61   : > { %s2555_s0 = scalar_lea.vmem [#allocation5], %s1626_s24 }
  0x62   : > { %2261 = dma.done.wait (%p2794_p6), %s213_s29, 16384  }
  0x63   : > { %2263 = vsyncadd (%p2794_p6), %s213_s29, 4294950912  ;;  %p247_p0 = scmp.lt.s32.totalorder %s2294_s19, 1  ;;  %p1629_p1 = scmp.ne.s32.totalorder %s2290_s18, 0 }
  0x64   : > { %v2313_v0 = vmov (!%p1629_p1), 0.0  }
  0x65   : > { %s2815_s19 = smov (!%p247_p0, %s2294_s19), 1  ;;  %256 = sbr.rel (%p1629_p1) target bundleno = 108 (0x6c), region = 44 }
  0x66   : > { %s1798_s23 = sshll.u32 %s2815_s19, 5  ;;  %257 = vst [vmem:[#allocation2] sm:$0xff] (!%p1629_p1), %v2313_v0  ;;  %258 = vst [vmem:[#allocation2 + $0x8] sm:$0xff] (!%p1629_p1), %v2313_v0 }
  0x67   : > { %s2566_s12 = scalar_lea.vmem %s2774_s3, %s1798_s23  ;;  %259 = vst [vmem:[#allocation2 + $0x10] sm:$0xff] (!%p1629_p1), %v2313_v0  ;;  %260 = vst [vmem:[#allocation2 + $0x18] sm:$0xff] (!%p1629_p1), %v2313_v0 }
  0x6c PF: > { %v1912_v1 = vld [vmem:[%s2548_s30 + $0x4] ss:$16 sps:$4 sm:$0xff]   ;;  %v1914_v2 = vld [vmem:[%s2548_s30 + $0xc] ss:$16 sps:$4 sm:$0xff]   ;;  %v2314_v3 = vmov 0   ;;  %s1630_s19 = sshll.u32 %s2290_s18, 7 }
  0x6d   : > { %495 = vmatprep.mubr.bf16.mxu0 %v2314_v3  ;;  %536 = vmatprep.mubr.bf16.mxu1 %v2314_v3  ;;  %v1916_v4 = vld [vmem:[%s2548_s30] ss:$16 sps:$4 sm:$0xff]   ;;  %v1917_v5 = vld [vmem:[%s2548_s30 + $0x8] ss:$16 sps:$4 sm:$0xff]   ;;  %v1918_v6 = vld [vmem:[%s2548_s30 + $0x24] ss:$16 sps:$4 sm:$0xff]  }
  0x6e   : > { %463 = vmatprep.subr.bf16.mxu0 %v1912_v1  ;;  %504 = vmatprep.subr.bf16.mxu1 %v1914_v2  ;;  %v1920_v7 = vld [vmem:[%s2548_s30 + $0x2c] ss:$16 sps:$4 sm:$0xff]   ;;  %v1922_v8 = vld [vmem:[%s2548_s30 + $0x20] ss:$16 sps:$4 sm:$0xff]   ;;  %v1923_v9 = vld [vmem:[%s2548_s30 + $0x28] ss:$16 sps:$4 sm:$0xff]  }
  0x6f   : > { %464 = vmatpush1.bf16.msra.mxu0 %v1916_v4  ;;  %505 = vmatpush1.bf16.msra.mxu1 %v1917_v5  ;;  %v1924_v10 = vld [vmem:[%s2548_s30 + $0x44] ss:$16 sps:$4 sm:$0xff]   ;;  %v1926_v11 = vld [vmem:[%s2548_s30 + $0x4c] ss:$16 sps:$4 sm:$0xff]   ;;  %v1928_v12 = vld [vmem:[%s2548_s30 + $0x40] ss:$16 sps:$4 sm:$0xff]  }
  0x70   : > { %465 = vmatprep.subr.bf16.mxu0 %v1918_v6  ;;  %506 = vmatprep.subr.bf16.mxu1 %v1920_v7  ;;  %v1929_v13 = vld [vmem:[%s2548_s30 + $0x48] ss:$16 sps:$4 sm:$0xff]   ;;  %v1930_v14 = vld [vmem:[%s2548_s30 + $0x64] ss:$16 sps:$4 sm:$0xff]   ;;  %v1932_v15 = vld [vmem:[%s2548_s30 + $0x6c] ss:$16 sps:$4 sm:$0xff]  }
  0x71   : > { %v1934_v16 = vld [vmem:[%s2548_s30 + $0x60] ss:$16 sps:$4 sm:$0xff]   ;;  %v1935_v17 = vld [vmem:[%s2548_s30 + $0x68] ss:$16 sps:$4 sm:$0xff]   ;;  %v1936_v18 = vld [vmem:[%s2548_s30 + $0x84] ss:$16 sps:$4 sm:$0xff]  }
  0x72   : > { %v1938_v19 = vld [vmem:[%s2548_s30 + $0x8c] ss:$16 sps:$4 sm:$0xff]   ;;  %v1940_v20 = vld [vmem:[%s2548_s30 + $0x80] ss:$16 sps:$4 sm:$0xff]   ;;  %v1941_v21 = vld [vmem:[%s2548_s30 + $0x88] ss:$16 sps:$4 sm:$0xff]  }
  0x73   : > { %466 = vmatpush1.bf16.msra.mxu0 %v1922_v8  ;;  %507 = vmatpush1.bf16.msra.mxu1 %v1923_v9  ;;  %v1942_v22 = vld [vmem:[%s2548_s30 + $0xa4] ss:$16 sps:$4 sm:$0xff]   ;;  %v1944_v23 = vld [vmem:[%s2548_s30 + $0xac] ss:$16 sps:$4 sm:$0xff]   ;;  %v1946_v24 = vld [vmem:[%s2548_s30 + $0xa0] ss:$16 sps:$4 sm:$0xff]  }
  0x74   : > { %467 = vmatprep.subr.bf16.mxu0 %v1924_v10  ;;  %508 = vmatprep.subr.bf16.mxu1 %v1926_v11  ;;  %v1947_v25 = vld [vmem:[%s2548_s30 + $0xa8] ss:$16 sps:$4 sm:$0xff]   ;;  %v1948_v26 = vld [vmem:[%s2548_s30 + $0xc4] ss:$16 sps:$4 sm:$0xff]   ;;  %v1950_v27 = vld [vmem:[%s2548_s30 + $0xcc] ss:$16 sps:$4 sm:$0xff]  }
  0x75   : > { %s262_s10 = sshra.s32 %s1630_s19, 7  ;;  %v1952_v28 = vld [vmem:[%s2548_s30 + $0xc0] ss:$16 sps:$4 sm:$0xff]   ;;  %v1953_v29 = vld [vmem:[%s2548_s30 + $0xc8] ss:$16 sps:$4 sm:$0xff]   ;;  %s2795_s26 = sld [smem:[#allocation11_spill]] }
  0x76   : > { %v1954_v30 = vld [vmem:[%s2548_s30 + $0xe4] ss:$16 sps:$4 sm:$0xff]   ;;  %v1956_v31 = vld [vmem:[%s2548_s30 + $0xec] ss:$16 sps:$4 sm:$0xff]   ;;  %s1631_s11 = sshll.u32 %s262_s10, 2  ;;  %p1664_p2 = scmp.ne.s32.totalorder %s2290_s18, 1 }
  0x77   : > { %468 = vmatpush1.bf16.msra.mxu0 %v1928_v12  ;;  %509 = vmatpush1.bf16.msra.mxu1 %v1929_v13  ;;  %v1958_v32 = vld [vmem:[%s2548_s30 + $0xe0] ss:$16 sps:$4 sm:$0xff]   ;;  %v1959_v33 = vld [vmem:[%s2548_s30 + $0xe8] ss:$16 sps:$4 sm:$0xff]   ;;  %v1960_v51 = vld [vmem:[%s2555_s0 + $0x4] ss:$16 sps:$4 sm:$0xff] (!%p1664_p2)  }
  0x78   : > { %469 = vmatprep.subr.bf16.mxu0 %v1930_v14  ;;  %510 = vmatprep.subr.bf16.mxu1 %v1932_v15  ;;  %v267_v35 = vld [vmem:[#allocation2] sm:$0xff]  ;;  %v269_v36 = vld [vmem:[#allocation2 + $0x10] sm:$0xff]  ;;  %v268_v37 = vld [vmem:[#allocation2 + $0x8] sm:$0xff] }
  0x79   : > { %v270_v38 = vld [vmem:[#allocation2 + $0x18] sm:$0xff]  ;;  %v1964_v53 = vld [vmem:[%s2555_s0] ss:$16 sps:$4 sm:$0xff] (!%p1664_p2)   ;;  %v1966_v55 = vld [vmem:[%s2555_s0 + $0x24] ss:$16 sps:$4 sm:$0xff] (!%p1664_p2)  }
  0x7a   : > { %v1962_v52 = vld [vmem:[%s2555_s0 + $0xc] ss:$16 sps:$4 sm:$0xff] (!%p1664_p2)   ;;  %v1965_v54 = vld [vmem:[%s2555_s0 + $0x8] ss:$16 sps:$4 sm:$0xff] (!%p1664_p2)   ;;  %v1970_v57 = vld [vmem:[%s2555_s0 + $0x20] ss:$16 sps:$4 sm:$0xff] (!%p1664_p2)  }
  0x7b   : > { %470 = vmatpush1.bf16.msra.mxu0 %v1934_v16  ;;  %511 = vmatpush1.bf16.msra.mxu1 %v1935_v17  ;;  %s265_s27 = scalar_lea.vmem %s2795_s26, %s1631_s11  ;;  %v1968_v56 = vld [vmem:[%s2555_s0 + $0x2c] ss:$16 sps:$4 sm:$0xff] (!%p1664_p2)   ;;  %v1971_v58 = vld [vmem:[%s2555_s0 + $0x28] ss:$16 sps:$4 sm:$0xff] (!%p1664_p2)   ;;  %v1972_v59 = vld [vmem:[%s2555_s0 + $0x44] ss:$16 sps:$4 sm:$0xff] (!%p1664_p2)  }
  0x7c   : > { %471 = vmatprep.subr.bf16.mxu0 %v1936_v18  ;;  %512 = vmatprep.subr.bf16.mxu1 %v1938_v19  ;;  %v266_v34 = vld [vmem:[%s265_s27] sm:$0xf]  ;;  %v1974_v60 = vld [vmem:[%s2555_s0 + $0x4c] ss:$16 sps:$4 sm:$0xff] (!%p1664_p2)   ;;  %v1977_v62 = vld [vmem:[%s2555_s0 + $0x48] ss:$16 sps:$4 sm:$0xff] (!%p1664_p2)  }
  0x7d   : > { %v1976_v61 = vld [vmem:[%s2555_s0 + $0x40] ss:$16 sps:$4 sm:$0xff] (!%p1664_p2)   ;;  %v1978_v63 = vld [vmem:[%s2555_s0 + $0x64] ss:$16 sps:$4 sm:$0xff] (!%p1664_p2)   ;;  %v1980_v0 = vld [vmem:[%s2555_s0 + $0x6c] ss:$16 sps:$4 sm:$0xff] (!%p1664_p2)  }
  0x7e   : > { %v1982_v1 = vld [vmem:[%s2555_s0 + $0x60] ss:$16 sps:$4 sm:$0xff] (!%p1664_p2)   ;;  %v1983_v2 = vld [vmem:[%s2555_s0 + $0x68] ss:$16 sps:$4 sm:$0xff] (!%p1664_p2)   ;;  %v1984_v3 = vld [vmem:[%s2555_s0 + $0x84] ss:$16 sps:$4 sm:$0xff] (!%p1664_p2)  }
  0x7f   : > { %472 = vmatpush1.bf16.msra.mxu0 %v1940_v20  ;;  %513 = vmatpush1.bf16.msra.mxu1 %v1941_v21  ;;  %v1986_v4 = vld [vmem:[%s2555_s0 + $0x8c] ss:$16 sps:$4 sm:$0xff] (!%p1664_p2)   ;;  %v1988_v5 = vld [vmem:[%s2555_s0 + $0x80] ss:$16 sps:$4 sm:$0xff] (!%p1664_p2)   ;;  %v1989_v6 = vld [vmem:[%s2555_s0 + $0x88] ss:$16 sps:$4 sm:$0xff] (!%p1664_p2)  }
  0x80   : > { %473 = vmatprep.subr.bf16.mxu0 %v1942_v22  ;;  %514 = vmatprep.subr.bf16.mxu1 %v1944_v23  ;;  %v1990_v7 = vld [vmem:[%s2555_s0 + $0xa4] ss:$16 sps:$4 sm:$0xff] (!%p1664_p2)   ;;  %v1992_v8 = vld [vmem:[%s2555_s0 + $0xac] ss:$16 sps:$4 sm:$0xff] (!%p1664_p2)   ;;  %v1994_v9 = vld [vmem:[%s2555_s0 + $0xa0] ss:$16 sps:$4 sm:$0xff] (!%p1664_p2)  }
  0x81   : > { %v1995_v10 = vld [vmem:[%s2555_s0 + $0xa8] ss:$16 sps:$4 sm:$0xff] (!%p1664_p2)   ;;  %v1996_v11 = vld [vmem:[%s2555_s0 + $0xc4] ss:$16 sps:$4 sm:$0xff] (!%p1664_p2)   ;;  %v1998_v12 = vld [vmem:[%s2555_s0 + $0xcc] ss:$16 sps:$4 sm:$0xff] (!%p1664_p2)  }
  0x82   : > { %v2000_v13 = vld [vmem:[%s2555_s0 + $0xc0] ss:$16 sps:$4 sm:$0xff] (!%p1664_p2)   ;;  %v2001_v14 = vld [vmem:[%s2555_s0 + $0xc8] ss:$16 sps:$4 sm:$0xff] (!%p1664_p2)   ;;  %v2002_v15 = vld [vmem:[%s2555_s0 + $0xe4] ss:$16 sps:$4 sm:$0xff] (!%p1664_p2)  }
  0x83   : > { %474 = vmatpush1.bf16.msra.mxu0 %v1946_v24  ;;  %515 = vmatpush1.bf16.msra.mxu1 %v1947_v25  ;;  %v2004_v16 = vld [vmem:[%s2555_s0 + $0xec] ss:$16 sps:$4 sm:$0xff] (!%p1664_p2)   ;;  %v2006_v17 = vld [vmem:[%s2555_s0 + $0xe0] ss:$16 sps:$4 sm:$0xff] (!%p1664_p2)   ;;  %v2007_v18 = vld [vmem:[%s2555_s0 + $0xe8] ss:$16 sps:$4 sm:$0xff] (!%p1664_p2)  }
  0x84   : > { %475 = vmatprep.subr.bf16.mxu0 %v1948_v26  ;;  %516 = vmatprep.subr.bf16.mxu1 %v1950_v27  ;;  %v2008_v19 = vld [vmem:[%s2555_s0 + $0x104] ss:$16 sps:$4 sm:$0xff] (!%p1664_p2)   ;;  %v2010_v20 = vld [vmem:[%s2555_s0 + $0x10c] ss:$16 sps:$4 sm:$0xff] (!%p1664_p2)   ;;  %v2012_v21 = vld [vmem:[%s2555_s0 + $0x100] ss:$16 sps:$4 sm:$0xff] (!%p1664_p2)  }
  0x85   : > { %v2013_v22 = vld [vmem:[%s2555_s0 + $0x108] ss:$16 sps:$4 sm:$0xff] (!%p1664_p2)   ;;  %v2014_v23 = vld [vmem:[%s2555_s0 + $0x124] ss:$16 sps:$4 sm:$0xff] (!%p1664_p2)   ;;  %v2016_v24 = vld [vmem:[%s2555_s0 + $0x12c] ss:$16 sps:$4 sm:$0xff] (!%p1664_p2)  }
  0x86   : > { %v2018_v25 = vld [vmem:[%s2555_s0 + $0x120] ss:$16 sps:$4 sm:$0xff] (!%p1664_p2)   ;;  %v2019_v26 = vld [vmem:[%s2555_s0 + $0x128] ss:$16 sps:$4 sm:$0xff] (!%p1664_p2)   ;;  %v2020_v27 = vld [vmem:[%s2555_s0 + $0x144] ss:$16 sps:$4 sm:$0xff] (!%p1664_p2)  }
  0x87   : > { %476 = vmatpush1.bf16.msra.mxu0 %v1952_v28  ;;  %517 = vmatpush1.bf16.msra.mxu1 %v1953_v29  ;;  %v2022_v28 = vld [vmem:[%s2555_s0 + $0x14c] ss:$16 sps:$4 sm:$0xff] (!%p1664_p2)   ;;  %v2024_v29 = vld [vmem:[%s2555_s0 + $0x140] ss:$16 sps:$4 sm:$0xff] (!%p1664_p2)  }
  0x88   : > { %477 = vmatprep.subr.bf16.mxu0 %v1954_v30  ;;  %518 = vmatprep.subr.bf16.mxu1 %v1956_v31  ;;  %v2025_v30 = vld [vmem:[%s2555_s0 + $0x148] ss:$16 sps:$4 sm:$0xff] (!%p1664_p2)   ;;  %v2026_v31 = vld [vmem:[%s2555_s0 + $0x164] ss:$16 sps:$4 sm:$0xff] (!%p1664_p2)  }
  0x8b   : > { %478 = vmatpush1.bf16.msra.mxu0 %v1958_v32  ;;  %519 = vmatpush1.bf16.msra.mxu1 %v1959_v33  ;;  %v2028_v32 = vld [vmem:[%s2555_s0 + $0x16c] ss:$16 sps:$4 sm:$0xff] (!%p1664_p2)  }
  0x8c   : > { %1337 = vmatprep.subr.bf16.mxu0 (!%p1664_p2), %v1960_v51  ;;  %1419 = vmatprep.subr.bf16.mxu1 (!%p1664_p2), %v1962_v52  ;;  %v2050_v51 = vld [vmem:[%s2555_s0 + $0x1e4] ss:$16 sps:$4 sm:$0xff] (!%p1664_p2)   ;;  %v2052_v52 = vld [vmem:[%s2555_s0 + $0x1ec] ss:$16 sps:$4 sm:$0xff] (!%p1664_p2)  }
  0x8e   : > { %496 = vmatmul.mubr.bf16.vlgmr.msra.gmra.mrb[0].mxu0 %v266_v34  ;;  %537 = vmatmul.mubr.bf16.vlgmr.msra.gmra.mrb[0].mxu1 %v266_v34  ;;  %v2030_v34 = vld [vmem:[%s2555_s0 + $0x160] ss:$16 sps:$4 sm:$0xff] (!%p1664_p2)  }
  0x8f   : > { %1338 = vmatpush1.bf16.msra.mxu0 (!%p1664_p2), %v1964_v53  ;;  %1420 = vmatpush1.bf16.msra.mxu1 (!%p1664_p2), %v1965_v54  ;;  %v2054_v54 = vld [vmem:[%s2555_s0 + $0x1e0] ss:$16 sps:$4 sm:$0xff] (!%p1664_p2)  }
  0x90   : > { %1339 = vmatprep.subr.bf16.mxu0 (!%p1664_p2), %v1966_v55  ;;  %1421 = vmatprep.subr.bf16.mxu1 (!%p1664_p2), %v1968_v56  ;;  %v2055_v55 = vld [vmem:[%s2555_s0 + $0x1e8] ss:$16 sps:$4 sm:$0xff] (!%p1664_p2)   ;;  %v2058_v56 = vld [vmem:[%s2555_s0 + $0x204] ss:$16 sps:$4 sm:$0xff] (!%p1664_p2)  }
  0x93   : > { %1340 = vmatpush1.bf16.msra.mxu0 (!%p1664_p2), %v1970_v57  ;;  %1422 = vmatpush1.bf16.msra.mxu1 (!%p1664_p2), %v1971_v58  ;;  %v2061_v57 = vld [vmem:[%s2555_s0 + $0x20c] ss:$16 sps:$4 sm:$0xff] (!%p1664_p2)  }
  0x94   : > { %1341 = vmatprep.subr.bf16.mxu0 (!%p1664_p2), %v1972_v59  ;;  %1423 = vmatprep.subr.bf16.mxu1 (!%p1664_p2), %v1974_v60  ;;  %v2056_v59 = vld [vmem:[%s2555_s0 + $0x200] ss:$16 sps:$4 sm:$0xff] (!%p1664_p2)   ;;  %v2059_v60 = vld [vmem:[%s2555_s0 + $0x208] ss:$16 sps:$4 sm:$0xff] (!%p1664_p2)  }
  0x97   : > { %1342 = vmatpush1.bf16.msra.mxu0 (!%p1664_p2), %v1976_v61  ;;  %1424 = vmatpush1.bf16.msra.mxu1 (!%p1664_p2), %v1977_v62  ;;  %v2064_v61 = vld [vmem:[%s2555_s0 + $0x224] ss:$16 sps:$4 sm:$0xff] (!%p1664_p2)   ;;  %v2067_v62 = vld [vmem:[%s2555_s0 + $0x22c] ss:$16 sps:$4 sm:$0xff] (!%p1664_p2)  }
  0x98   : > { %1343 = vmatprep.subr.bf16.mxu0 (!%p1664_p2), %v1978_v63  ;;  %1425 = vmatprep.subr.bf16.mxu1 (!%p1664_p2), %v1980_v0  ;;  %v2062_v63 = vld [vmem:[%s2555_s0 + $0x220] ss:$16 sps:$4 sm:$0xff] (!%p1664_p2)   ;;  %v2065_v0 = vld [vmem:[%s2555_s0 + $0x228] ss:$16 sps:$4 sm:$0xff] (!%p1664_p2)  }
  0x9b   : > { %1344 = vmatpush1.bf16.msra.mxu0 (!%p1664_p2), %v1982_v1  ;;  %1426 = vmatpush1.bf16.msra.mxu1 (!%p1664_p2), %v1983_v2  ;;  %v2070_v1 = vld [vmem:[%s2555_s0 + $0x244] ss:$16 sps:$4 sm:$0xff] (!%p1664_p2)   ;;  %v2073_v2 = vld [vmem:[%s2555_s0 + $0x24c] ss:$16 sps:$4 sm:$0xff] (!%p1664_p2)  }
  0x9c   : > { %1345 = vmatprep.subr.bf16.mxu0 (!%p1664_p2), %v1984_v3  ;;  %1427 = vmatprep.subr.bf16.mxu1 (!%p1664_p2), %v1986_v4  ;;  %v2068_v3 = vld [vmem:[%s2555_s0 + $0x240] ss:$16 sps:$4 sm:$0xff] (!%p1664_p2)   ;;  %v2071_v4 = vld [vmem:[%s2555_s0 + $0x248] ss:$16 sps:$4 sm:$0xff] (!%p1664_p2)  }
  0x9f   : > { %1346 = vmatpush1.bf16.msra.mxu0 (!%p1664_p2), %v1988_v5  ;;  %1428 = vmatpush1.bf16.msra.mxu1 (!%p1664_p2), %v1989_v6  ;;  %v2076_v5 = vld [vmem:[%s2555_s0 + $0x264] ss:$16 sps:$4 sm:$0xff] (!%p1664_p2)   ;;  %v2079_v6 = vld [vmem:[%s2555_s0 + $0x26c] ss:$16 sps:$4 sm:$0xff] (!%p1664_p2)  }
  0xa0   : > { %1347 = vmatprep.subr.bf16.mxu0 (!%p1664_p2), %v1990_v7  ;;  %1429 = vmatprep.subr.bf16.mxu1 (!%p1664_p2), %v1992_v8  ;;  %v2074_v7 = vld [vmem:[%s2555_s0 + $0x260] ss:$16 sps:$4 sm:$0xff] (!%p1664_p2)   ;;  %v2077_v8 = vld [vmem:[%s2555_s0 + $0x268] ss:$16 sps:$4 sm:$0xff] (!%p1664_p2)  }
  0xa3   : > { %1348 = vmatpush1.bf16.msra.mxu0 (!%p1664_p2), %v1994_v9  ;;  %1430 = vmatpush1.bf16.msra.mxu1 (!%p1664_p2), %v1995_v10  ;;  %v2082_v9 = vld [vmem:[%s2555_s0 + $0x284] ss:$16 sps:$4 sm:$0xff] (!%p1664_p2)   ;;  %v2085_v10 = vld [vmem:[%s2555_s0 + $0x28c] ss:$16 sps:$4 sm:$0xff] (!%p1664_p2)  }
  0xa4   : > { %1349 = vmatprep.subr.bf16.mxu0 (!%p1664_p2), %v1996_v11  ;;  %1431 = vmatprep.subr.bf16.mxu1 (!%p1664_p2), %v1998_v12  ;;  %v2080_v11 = vld [vmem:[%s2555_s0 + $0x280] ss:$16 sps:$4 sm:$0xff] (!%p1664_p2)   ;;  %v2083_v12 = vld [vmem:[%s2555_s0 + $0x288] ss:$16 sps:$4 sm:$0xff] (!%p1664_p2)  }
  0xa7   : > { %1350 = vmatpush1.bf16.msra.mxu0 (!%p1664_p2), %v2000_v13  ;;  %1432 = vmatpush1.bf16.msra.mxu1 (!%p1664_p2), %v2001_v14  ;;  %v2088_v13 = vld [vmem:[%s2555_s0 + $0x2a4] ss:$16 sps:$4 sm:$0xff] (!%p1664_p2)   ;;  %v2091_v14 = vld [vmem:[%s2555_s0 + $0x2ac] ss:$16 sps:$4 sm:$0xff] (!%p1664_p2)  }
  0xa8   : > { %1351 = vmatprep.subr.bf16.mxu0 (!%p1664_p2), %v2002_v15  ;;  %1433 = vmatprep.subr.bf16.mxu1 (!%p1664_p2), %v2004_v16  ;;  %v2086_v15 = vld [vmem:[%s2555_s0 + $0x2a0] ss:$16 sps:$4 sm:$0xff] (!%p1664_p2)   ;;  %v2089_v16 = vld [vmem:[%s2555_s0 + $0x2a8] ss:$16 sps:$4 sm:$0xff] (!%p1664_p2)  }
  0xab   : > { %1352 = vmatpush1.bf16.msra.mxu0 (!%p1664_p2), %v2006_v17  ;;  %1434 = vmatpush1.bf16.msra.mxu1 (!%p1664_p2), %v2007_v18  ;;  %v2094_v17 = vld [vmem:[%s2555_s0 + $0x2c4] ss:$16 sps:$4 sm:$0xff] (!%p1664_p2)   ;;  %v2097_v18 = vld [vmem:[%s2555_s0 + $0x2cc] ss:$16 sps:$4 sm:$0xff] (!%p1664_p2)  }
  0xac   : > { %1353 = vmatprep.subr.bf16.mxu0 (!%p1664_p2), %v2008_v19  ;;  %1435 = vmatprep.subr.bf16.mxu1 (!%p1664_p2), %v2010_v20 }
  0xaf   : > { %1354 = vmatpush1.bf16.msra.mxu0 (!%p1664_p2), %v2012_v21  ;;  %1436 = vmatpush1.bf16.msra.mxu1 (!%p1664_p2), %v2013_v22  ;;  %v2092_v21 = vld [vmem:[%s2555_s0 + $0x2c0] ss:$16 sps:$4 sm:$0xff] (!%p1664_p2)   ;;  %v2095_v22 = vld [vmem:[%s2555_s0 + $0x2c8] ss:$16 sps:$4 sm:$0xff] (!%p1664_p2)  }
  0xb0   : > { %1355 = vmatprep.subr.bf16.mxu0 (!%p1664_p2), %v2014_v23  ;;  %1437 = vmatprep.subr.bf16.mxu1 (!%p1664_p2), %v2016_v24  ;;  %v2100_v23 = vld [vmem:[%s2555_s0 + $0x2e4] ss:$16 sps:$4 sm:$0xff] (!%p1664_p2)   ;;  %v2103_v24 = vld [vmem:[%s2555_s0 + $0x2ec] ss:$16 sps:$4 sm:$0xff] (!%p1664_p2)  }
  0xb3   : > { %1356 = vmatpush1.bf16.msra.mxu0 (!%p1664_p2), %v2018_v25  ;;  %1438 = vmatpush1.bf16.msra.mxu1 (!%p1664_p2), %v2019_v26  ;;  %v2098_v26 = vld [vmem:[%s2555_s0 + $0x2e0] ss:$16 sps:$4 sm:$0xff] (!%p1664_p2)  }
  0xb4   : > { %1357 = vmatprep.subr.bf16.mxu0 (!%p1664_p2), %v2020_v27  ;;  %1439 = vmatprep.subr.bf16.mxu1 (!%p1664_p2), %v2022_v28  ;;  %v2101_v27 = vld [vmem:[%s2555_s0 + $0x2e8] ss:$16 sps:$4 sm:$0xff] (!%p1664_p2)   ;;  %v2106_v28 = vld [vmem:[%s2555_s0 + $0x304] ss:$16 sps:$4 sm:$0xff] (!%p1664_p2)  }
  0xb7   : > { %1358 = vmatpush1.bf16.msra.mxu0 (!%p1664_p2), %v2024_v29  ;;  %1440 = vmatpush1.bf16.msra.mxu1 (!%p1664_p2), %v2025_v30  ;;  %v2109_v29 = vld [vmem:[%s2555_s0 + $0x30c] ss:$16 sps:$4 sm:$0xff] (!%p1664_p2)   ;;  %v2104_v30 = vld [vmem:[%s2555_s0 + $0x300] ss:$16 sps:$4 sm:$0xff] (!%p1664_p2)  }
  0xb8   : > { %1359 = vmatprep.subr.bf16.mxu0 (!%p1664_p2), %v2026_v31  ;;  %1441 = vmatprep.subr.bf16.mxu1 (!%p1664_p2), %v2028_v32  ;;  %v2107_v31 = vld [vmem:[%s2555_s0 + $0x308] ss:$16 sps:$4 sm:$0xff] (!%p1664_p2)   ;;  %v2112_v32 = vld [vmem:[%s2555_s0 + $0x324] ss:$16 sps:$4 sm:$0xff] (!%p1664_p2)  }
  0xbb   : > { %1360 = vmatpush1.bf16.msra.mxu0 (!%p1664_p2), %v2030_v34  ;;  %v2110_v34 = vld [vmem:[%s2555_s0 + $0x320] ss:$16 sps:$4 sm:$0xff] (!%p1664_p2)  }
 0x15f   : > { %556 = sbr.rel (%p1664_p2) target bundleno = 653 (0x28d), region = 48 }
 0x161   : > { %v497_v39 = vpop.f32.mrb[0].mxu0  ;;  %v538_v40 = vpop.f32.mrb[0].mxu1 }
 0x162   : > { %v545_v41 = vadd.f32 %v497_v39, %v267_v35  ;;  %v547_v42 = vadd.f32 %v538_v40, %v269_v36  ;;  %v499_v43 = vpop.f32.mrb[1].mxu0  ;;  %v540_v44 = vpop.f32.mrb[1].mxu1  ;;  %v2031_v36 = vld [vmem:[%s2555_s0 + $0x168] ss:$16 sps:$4 sm:$0xff] (!%p1664_p2)   ;;  %v2036_v40 = vld [vmem:[%s2555_s0 + $0x180] ss:$16 sps:$4 sm:$0xff] (!%p1664_p2)  }
 0x163   : > { %v546_v45 = vadd.f32 %v499_v43, %v268_v37  ;;  %v548_v46 = vadd.f32 %v540_v44, %v270_v38  ;;  %v501_v47 = vpop.f32.mrb[2].mxu0  ;;  %v542_v48 = vpop.f32.mrb[2].mxu1  ;;  %v2032_v37 = vld [vmem:[%s2555_s0 + $0x184] ss:$16 sps:$4 sm:$0xff] (!%p1664_p2)   ;;  %v2034_v38 = vld [vmem:[%s2555_s0 + $0x18c] ss:$16 sps:$4 sm:$0xff] (!%p1664_p2)   ;;  %1442 = vmatpush1.bf16.msra.mxu1 (!%p1664_p2), %v2031_v36 }
 0x164   : > { %549 = vst [vmem:[#allocation2] sm:$0xff] %v545_v41  ;;  %551 = vst [vmem:[#allocation2 + $0x10] sm:$0xff] %v547_v42  ;;  %v502_v49 = vpop.f32.mrb[3].mxu0  ;;  %v543_v50 = vpop.f32.mrb[3].mxu1  ;;  %v2037_v41 = vld [vmem:[%s2555_s0 + $0x188] ss:$16 sps:$4 sm:$0xff] (!%p1664_p2)   ;;  %1361 = vmatprep.subr.bf16.mxu0 (!%p1664_p2), %v2032_v37  ;;  %1443 = vmatprep.subr.bf16.mxu1 (!%p1664_p2), %v2034_v38 }
 0x165   : > { %550 = vst [vmem:[#allocation2 + $0x8] sm:$0xff] %v546_v45  ;;  %552 = vst [vmem:[#allocation2 + $0x18] sm:$0xff] %v548_v46  ;;  %v2038_v42 = vld [vmem:[%s2555_s0 + $0x1a4] ss:$16 sps:$4 sm:$0xff] (!%p1664_p2)   ;;  %v2040_v43 = vld [vmem:[%s2555_s0 + $0x1ac] ss:$16 sps:$4 sm:$0xff] (!%p1664_p2)   ;;  %1362 = vmatpush1.bf16.msra.mxu0 (!%p1664_p2), %v2036_v40 }
 0x166   : > { %v2042_v44 = vld [vmem:[%s2555_s0 + $0x1a0] ss:$16 sps:$4 sm:$0xff]   ;;  %v2043_v45 = vld [vmem:[%s2555_s0 + $0x1a8] ss:$16 sps:$4 sm:$0xff]   ;;  %1363 = vmatprep.subr.bf16.mxu0 %v2038_v42  ;;  %v2044_v46 = vld [vmem:[%s2555_s0 + $0x1c4] ss:$16 sps:$4 sm:$0xff]  }
 0x167   : > { %1444 = vmatpush1.bf16.msra.mxu1 %v2037_v41  ;;  %v2046_v47 = vld [vmem:[%s2555_s0 + $0x1cc] ss:$16 sps:$4 sm:$0xff]   ;;  %v2048_v48 = vld [vmem:[%s2555_s0 + $0x1c0] ss:$16 sps:$4 sm:$0xff]   ;;  %v2049_v49 = vld [vmem:[%s2555_s0 + $0x1c8] ss:$16 sps:$4 sm:$0xff]  }
 0x168   : > { %1445 = vmatprep.subr.bf16.mxu1 %v2040_v43  ;;  %v2118_v36 = vld [vmem:[%s2555_s0 + $0x344] ss:$16 sps:$4 sm:$0xff]   ;;  %v2121_v37 = vld [vmem:[%s2555_s0 + $0x34c] ss:$16 sps:$4 sm:$0xff]   ;;  %v2116_v38 = vld [vmem:[%s2555_s0 + $0x340] ss:$16 sps:$4 sm:$0xff]  }
 0x169   : > { %1364 = vmatpush1.bf16.msra.mxu0 %v2042_v44  ;;  %v2124_v40 = vld [vmem:[%s2555_s0 + $0x364] ss:$16 sps:$4 sm:$0xff]   ;;  %v2127_v41 = vld [vmem:[%s2555_s0 + $0x36c] ss:$16 sps:$4 sm:$0xff]   ;;  %v2122_v42 = vld [vmem:[%s2555_s0 + $0x360] ss:$16 sps:$4 sm:$0xff]  }
 0x16a   : > { %1365 = vmatprep.subr.bf16.mxu0 %v2044_v46  ;;  %v2125_v43 = vld [vmem:[%s2555_s0 + $0x368] ss:$16 sps:$4 sm:$0xff]   ;;  %v2130_v44 = vld [vmem:[%s2555_s0 + $0x384] ss:$16 sps:$4 sm:$0xff]   ;;  %v2128_v46 = vld [vmem:[%s2555_s0 + $0x380] ss:$16 sps:$4 sm:$0xff]  }
 0x16b   : > { %1446 = vmatpush1.bf16.msra.mxu1 %v2043_v45  ;;  %v557_v50 = vld [vmem:[#allocation2] sm:$0xff]  ;;  %v2133_v45 = vld [vmem:[%s2555_s0 + $0x38c] ss:$16 sps:$4 sm:$0xff]  }
 0x16c   : > { %v558_v33 = vld [vmem:[#allocation2 + $0x8] sm:$0xff]  ;;  %1447 = vmatprep.subr.bf16.mxu1 %v2046_v47  ;;  %v561_v53 = vmax.f32 %v557_v50, 0.0  ;;  %v560_v19 = vld [vmem:[#allocation2 + $0x18] sm:$0xff]  ;;  %v2134_v50 = vld [vmem:[%s2555_s0 + $0x3a0] ss:$16 sps:$4 sm:$0xff]  }
 0x16d   : > { %v562_v35 = vmax.f32 %v558_v33, 0.0  ;;  %1366 = vmatpush1.bf16.msra.mxu0 %v2048_v48  ;;  %v564_v20 = vmax.f32 %v560_v19, 0.0  ;;  %v2115_v33 = vld [vmem:[%s2555_s0 + $0x32c] ss:$16 sps:$4 sm:$0xff]   ;;  %v2131_v47 = vld [vmem:[%s2555_s0 + $0x388] ss:$16 sps:$4 sm:$0xff]  }
 0x16e   : > { %1367 = vmatprep.subr.bf16.mxu0 %v2050_v51  ;;  %v565_v58 = vpack.c.bf16 %v561_v53, %v561_v53  ;;  %v2136_v48 = vld [vmem:[%s2555_s0 + $0x3a4] ss:$16 sps:$4 sm:$0xff]   ;;  %v2137_v51 = vld [vmem:[%s2555_s0 + $0x3a8] ss:$16 sps:$4 sm:$0xff]   ;;  %v2145_v53 = vld [vmem:[%s2555_s0 + $0x3cc] ss:$16 sps:$4 sm:$0xff]  }
 0x16f   : > { %v566_v39 = vpack.c.bf16 %v562_v35, %v562_v35  ;;  %1448 = vmatpush1.bf16.msra.mxu1 %v2049_v49  ;;  %v568_v25 = vpack.c.bf16 %v564_v20, %v564_v20  ;;  %v2113_v35 = vld [vmem:[%s2555_s0 + $0x328] ss:$16 sps:$4 sm:$0xff]   ;;  %v2139_v49 = vld [vmem:[%s2555_s0 + $0x3ac] ss:$16 sps:$4 sm:$0xff]  }
 0x170   : > { %1449 = vmatprep.subr.bf16.mxu1 %v2052_v52  ;;  %v2142_v52 = vld [vmem:[%s2555_s0 + $0x3c4] ss:$16 sps:$4 sm:$0xff]  }
 0x171   : > { %1369 = vmatprep.mubr.bf16.mxu0 %v566_v39  ;;  %1451 = vmatprep.mubr.bf16.mxu1 %v566_v39  ;;  %v2119_v39 = vld [vmem:[%s2555_s0 + $0x348] ss:$16 sps:$4 sm:$0xff]  }
 0x172   : > { %1368 = vmatpush1.bf16.msra.mxu0 %v2054_v54  ;;  %v2140_v54 = vld [vmem:[%s2555_s0 + $0x3c0] ss:$16 sps:$4 sm:$0xff]  }
 0x173   : > { %1450 = vmatpush1.bf16.msra.mxu1 %v2055_v55  ;;  %1378 = vmatprep.subr.bf16.mxu0 %v2058_v56  ;;  %v2143_v55 = vld [vmem:[%s2555_s0 + $0x3c8] ss:$16 sps:$4 sm:$0xff]   ;;  %v559_v56 = vld [vmem:[#allocation2 + $0x10] sm:$0xff] }
 0x174   : > { %1460 = vmatprep.subr.bf16.mxu1 %v2061_v57  ;;  %v2148_v57 = vld [vmem:[%s2555_s0 + $0x3e4] ss:$16 sps:$4 sm:$0xff]  }
 0x175   : > { %1370 = vmatmul.mubr.bf16.vlgmr.msra.gmra.mrb[0].mxu0 %v565_v58 }
 0x176   : > { %1452 = vmatmul.mubr.bf16.vlgmr.msra.gmra.mrb[0].mxu1 %v565_v58  ;;  %1379 = vmatpush1.bf16.msra.mxu0 %v2056_v59  ;;  %v2151_v58 = vld [vmem:[%s2555_s0 + $0x3ec] ss:$16 sps:$4 sm:$0xff]   ;;  %v563_v59 = vmax.f32 %v559_v56, 0.0 }
 0x177   : > { %1461 = vmatpush1.bf16.msra.mxu1 %v2059_v60  ;;  %1380 = vmatprep.subr.bf16.mxu0 %v2064_v61  ;;  %v2146_v60 = vld [vmem:[%s2555_s0 + $0x3e0] ss:$16 sps:$4 sm:$0xff]   ;;  %v2149_v61 = vld [vmem:[%s2555_s0 + $0x3e8] ss:$16 sps:$4 sm:$0xff]  }
 0x178   : > { %1462 = vmatprep.subr.bf16.mxu1 %v2067_v62  ;;  %1410 = vmatprep.mubr.bf16.mxu0 %v568_v25  ;;  %v567_v62 = vpack.c.bf16 %v563_v59, %v563_v59 }
 0x179   : > { %1492 = vmatprep.mubr.bf16.mxu1 %v568_v25 }
 0x17a   : > { %1381 = vmatpush1.bf16.msra.mxu0 %v2062_v63 }
 0x17b   : > { %1463 = vmatpush1.bf16.msra.mxu1 %v2065_v0  ;;  %1382 = vmatprep.subr.bf16.mxu0 %v2070_v1 }
 0x17c   : > { %1464 = vmatprep.subr.bf16.mxu1 %v2073_v2 }
 0x17e   : > { %1383 = vmatpush1.bf16.msra.mxu0 %v2068_v3 }
 0x17f   : > { %1465 = vmatpush1.bf16.msra.mxu1 %v2071_v4  ;;  %1384 = vmatprep.subr.bf16.mxu0 %v2076_v5 }
 0x180   : > { %1466 = vmatprep.subr.bf16.mxu1 %v2079_v6 }
 0x182   : > { %1385 = vmatpush1.bf16.msra.mxu0 %v2074_v7 }
 0x183   : > { %1467 = vmatpush1.bf16.msra.mxu1 %v2077_v8  ;;  %1386 = vmatprep.subr.bf16.mxu0 %v2082_v9 }
 0x184   : > { %1468 = vmatprep.subr.bf16.mxu1 %v2085_v10 }
 0x186   : > { %1387 = vmatpush1.bf16.msra.mxu0 %v2080_v11 }
 0x187   : > { %1469 = vmatpush1.bf16.msra.mxu1 %v2083_v12  ;;  %1388 = vmatprep.subr.bf16.mxu0 %v2088_v13 }
 0x188   : > { %1470 = vmatprep.subr.bf16.mxu1 %v2091_v14 }
 0x18a   : > { %1389 = vmatpush1.bf16.msra.mxu0 %v2086_v15 }
 0x18b   : > { %1471 = vmatpush1.bf16.msra.mxu1 %v2089_v16  ;;  %1390 = vmatprep.subr.bf16.mxu0 %v2094_v17 }
 0x18c   : > { %1472 = vmatprep.subr.bf16.mxu1 %v2097_v18 }
 0x18e   : > { %1391 = vmatpush1.bf16.msra.mxu0 %v2092_v21 }
 0x18f   : > { %1473 = vmatpush1.bf16.msra.mxu1 %v2095_v22  ;;  %1392 = vmatprep.subr.bf16.mxu0 %v2100_v23 }
 0x190   : > { %1474 = vmatprep.subr.bf16.mxu1 %v2103_v24 }
 0x192   : > { %1393 = vmatpush1.bf16.msra.mxu0 %v2098_v26 }
 0x193   : > { %1475 = vmatpush1.bf16.msra.mxu1 %v2101_v27  ;;  %1394 = vmatprep.subr.bf16.mxu0 %v2106_v28 }
 0x194   : > { %1476 = vmatprep.subr.bf16.mxu1 %v2109_v29 }
 0x196   : > { %1395 = vmatpush1.bf16.msra.mxu0 %v2104_v30 }
 0x197   : > { %1477 = vmatpush1.bf16.msra.mxu1 %v2107_v31  ;;  %1396 = vmatprep.subr.bf16.mxu0 %v2112_v32 }
 0x198   : > { %1478 = vmatprep.subr.bf16.mxu1 %v2115_v33 }
 0x19a   : > { %1397 = vmatpush1.bf16.msra.mxu0 %v2110_v34 }
 0x19b   : > { %1479 = vmatpush1.bf16.msra.mxu1 %v2113_v35  ;;  %1398 = vmatprep.subr.bf16.mxu0 %v2118_v36 }
 0x19c   : > { %1480 = vmatprep.subr.bf16.mxu1 %v2121_v37 }
 0x19e   : > { %1399 = vmatpush1.bf16.msra.mxu0 %v2116_v38 }
 0x19f   : > { %1481 = vmatpush1.bf16.msra.mxu1 %v2119_v39  ;;  %1400 = vmatprep.subr.bf16.mxu0 %v2124_v40 }
 0x1a0   : > { %1482 = vmatprep.subr.bf16.mxu1 %v2127_v41 }
 0x1a2   : > { %1401 = vmatpush1.bf16.msra.mxu0 %v2122_v42 }
 0x1a3   : > { %1483 = vmatpush1.bf16.msra.mxu1 %v2125_v43  ;;  %1402 = vmatprep.subr.bf16.mxu0 %v2130_v44 }
 0x1a4   : > { %1484 = vmatprep.subr.bf16.mxu1 %v2133_v45 }
 0x1a6   : > { %1403 = vmatpush1.bf16.msra.mxu0 %v2128_v46 }
 0x1a7   : > { %1485 = vmatpush1.bf16.msra.mxu1 %v2131_v47  ;;  %1404 = vmatprep.subr.bf16.mxu0 %v2136_v48 }
 0x1a8   : > { %1486 = vmatprep.subr.bf16.mxu1 %v2139_v49 }
 0x1aa   : > { %1405 = vmatpush1.bf16.msra.mxu0 %v2134_v50 }
 0x1ab   : > { %1487 = vmatpush1.bf16.msra.mxu1 %v2137_v51  ;;  %1406 = vmatprep.subr.bf16.mxu0 %v2142_v52 }
 0x1ac   : > { %1488 = vmatprep.subr.bf16.mxu1 %v2145_v53 }
 0x1ae   : > { %1407 = vmatpush1.bf16.msra.mxu0 %v2140_v54 }
 0x1af   : > { %1489 = vmatpush1.bf16.msra.mxu1 %v2143_v55  ;;  %1408 = vmatprep.subr.bf16.mxu0 %v2148_v57 }
 0x1b0   : > { %1490 = vmatprep.subr.bf16.mxu1 %v2151_v58 }
 0x1b2   : > { %1409 = vmatpush1.bf16.msra.mxu0 %v2146_v60 }
 0x1b3   : > { %1491 = vmatpush1.bf16.msra.mxu1 %v2149_v61 }
 0x1b5   : > { %1411 = vmatmul.mubr.bf16.vlgmr.msra.gmra.mrb[0].mxu0 %v567_v62 }
 0x1b6   : > { %1493 = vmatmul.mubr.bf16.vlgmr.msra.gmra.mrb[0].mxu1 %v567_v62 }
 0x288   : > { %v1412_v63 = vpop.f32.mrb[0].mxu0 }
 0x289   : > { %v1494_v0 = vpop.f32.mrb[0].mxu1  ;;  %1501 = vst [vmem:[%s2566_s12] sm:$0xff] %v1412_v63  ;;  %v1414_v1 = vpop.f32.mrb[1].mxu0 }
 0x28a   : > { %1503 = vst [vmem:[%s2566_s12 + $0x10] sm:$0xff] %v1494_v0  ;;  %v1496_v2 = vpop.f32.mrb[1].mxu1  ;;  %1502 = vst [vmem:[%s2566_s12 + $0x8] sm:$0xff] %v1414_v1  ;;  %v1416_v3 = vpop.f32.mrb[2].mxu0 }
 0x28b   : > { %1504 = vst [vmem:[%s2566_s12 + $0x18] sm:$0xff] %v1496_v2  ;;  %v1498_v4 = vpop.f32.mrb[2].mxu1  ;;  %v1417_v5 = vpop.f32.mrb[3].mxu0 }
 0x28c   : > { %v1499_v6 = vpop.f32.mrb[3].mxu1 }
 0x28d PF: > { %s19_s22 = sadd.s32 1, %s2306_s22   ;;  %s2796_s28 = sld [smem:[#allocation9_spill]] }
 0x28e   : > { %p16_p11 = scmp.ge.s32.totalorder %s19_s22, 6   ;;  %s2797_s6 = sld [smem:[#allocation10_spill]] }
 0x28f   : > { %s2798_s12 = smov %s2270_s13  ;;  %s2799_s13 = smov %s2274_s14 }
 0x290   : > { %s2800_s14 = smov %s2480_s5  ;;  %s2801_s15 = smov %s2282_s16 }
 0x291   : > { %s2802_s16 = smov %s2286_s17  ;;  %s2803_s17 = smov %s2422_s7 }
 0x292   : > { %s2804_s18 = smov %s2298_s20  ;;  %s2805_s19 = smov %s2302_s21 }
 0x293   : > { %s2806_s20 = smov %s2796_s28  ;;  %18 = sbr.rel (!%p16_p11) target bundleno = 11 (0xb), region = 94 }
 0x294   : > { %s2807_s21 = smov %s2797_s6 }
 0x29a   :  { %1526 = vsyncpa [#allocation4], 1 }
 0x29b   :  { %1528 = vsyncpa [#allocation4 + $0x1], 1 }
 0x29c   :  { %1529 = vsyncpa [#allocation6], 1 }
 0x29d   :  { %1531 = vsyncpa [#allocation6 + $0x1], 1 }

</bundles_post_ra>
